<compile_context>
chip_gen: v5e
topology: v5e:2x2
jax: 0.10.0
libtpu: 0.0.40
codegen_flags: <defaults>
</compile_context>

<pallas_src>
import jax
import jax.numpy as jnp
from jax.experimental import pallas as pl
from jax.experimental.pallas import tpu as pltpu


# ----------------------------------------------------------------------------
# In-kernel helpers (traced inside the Pallas kernels)
# ----------------------------------------------------------------------------
def _layernorm(x, g, b):
    # Matches the reference: mean / unbiased var (torch.var default) / eps=1e-12.
    mean = jnp.mean(x, axis=-1, keepdims=True)
    d = x.shape[-1]
    var = jnp.sum((x - mean) ** 2, axis=-1, keepdims=True) * (1.0 / (d - 1))
    return (x - mean) * g * jax.lax.rsqrt(var + 1e-12) + b


def _mha(q_in, k_in, v_in, wq, wk, wv, wo, bo, mask=None):
    """Batched multi-head attention.

    q_in/k_in/v_in : fp32 [sq, d_model] / [sk, d_model]
    wq/wk/wv       : bf16 [H, d_model, d_head]  (head h == cols h*dh:(h+1)*dh of ref weight)
    wo             : bf16 [H, d_head, d_model]  (head h == rows h*dh:(h+1)*dh of ref proj)
    bo             : fp32 [1, d_model]
    mask           : optional bool [sq, sk], True where a score is masked out.

    NOTE: the reference softmaxes over dim=-2 (the *query* axis); reproduced exactly.
    Scores are kept in (head, query, key) layout so every dot_general stays in the
    natively supported batched form; at these sequence lengths the resulting sublane
    (axis=-2) reduction is negligible.
    """
    H, d_model, d_head = wq.shape
    sq, sk = q_in.shape[0], k_in.shape[0]

    # Head-batched projections: the head axis lives in the (host-reshaped) weights,
    # the activation is broadcast across heads (cheap at small H, zero relayouts).
    qb = jnp.broadcast_to(q_in.astype(jnp.bfloat16), (H, sq, d_model))
    kb = jnp.broadcast_to(k_in.astype(jnp.bfloat16), (H, sk, d_model))
    vb = jnp.broadcast_to(v_in.astype(jnp.bfloat16), (H, sk, d_model))

    Q = jnp.einsum("hsd,hdf->hsf", qb, wq, preferred_element_type=jnp.float32)
    K = jnp.einsum("hsd,hdf->hsf", kb, wk, preferred_element_type=jnp.float32)
    V = jnp.einsum("hsd,hdf->hsf", vb, wv, preferred_element_type=jnp.float32)

    # scores[h, q, k] = <Q[h,q], K[h,k]> / sqrt(d_head) -- no explicit K transpose.
    s = jnp.einsum("hqf,hkf->hqk",
                   Q.astype(jnp.bfloat16), K.astype(jnp.bfloat16),
                   preferred_element_type=jnp.float32)
    s = s * (1.0 / (d_head ** 0.5))
    if mask is not None:
        s = jnp.where(mask, -jnp.inf, s)

    # Reference softmax is over the *query* axis (dim=-2).
    m = jnp.max(s, axis=-2, keepdims=True)
    e = jnp.exp(s - m)
    p = e * pl.reciprocal(jnp.sum(e, axis=-2, keepdims=True), approx=True)

    # out[h, q, f] = sum_k p[h, q, k] * V[h, k, f]
    o = jnp.einsum("hqk,hkf->hqf",
                   p.astype(jnp.bfloat16), V.astype(jnp.bfloat16),
                   preferred_element_type=jnp.float32)
    # Fused "concat heads + output projection": per-head matmul, then sum over heads.
    proj = jnp.einsum("hqf,hfd->hqd", o.astype(jnp.bfloat16), wo,
                      preferred_element_type=jnp.float32)
    return jnp.sum(proj, axis=0) + bo


def _ffn(x, w1, bf1, w2, bf2):
    h = jnp.dot(x.astype(jnp.bfloat16), w1, preferred_element_type=jnp.float32) + bf1
    h = jnp.maximum(h, 0.0)
    return jnp.dot(h.astype(jnp.bfloat16), w2, preferred_element_type=jnp.float32) + bf2


# ----------------------------------------------------------------------------
# Fused-stack Pallas kernels: grid=(depth,), activation resident in the output block
# ----------------------------------------------------------------------------
def _encoder_stack_kernel(x_ref,
                          wq, wk, wv, wo, bo, g1, b1,
                          w1, bf1, w2, bf2, g2, b2,
                          out_ref):
    layer = pl.program_id(0)

    @pl.when(layer == 0)
    def _():
        out_ref[...] = x_ref[...]      # activation lives in the resident output block

    x = out_ref[...]
    x = x + _mha(x, x, x, wq[...], wk[...], wv[...], wo[...], bo[...])
    x = _layernorm(x, g1[...], b1[...])
    x = x + _ffn(x, w1[...], bf1[...], w2[...], bf2[...])
    x = _layernorm(x, g2[...], b2[...])
    out_ref[...] = x


def _decoder_stack_kernel(x_ref, y_ref,
                          wq1, wk1, wv1, wo1, bo1, g1, b1,
                          wq2, wk2, wv2, wo2, bo2, g2, b2,
                          w1, bf1, w2, bf2, g3, b3,
                          out_ref):
    layer = pl.program_id(0)

    @pl.when(layer == 0)
    def _():
        out_ref[...] = x_ref[...]

    x = out_ref[...]
    y = y_ref[...]                     # constant block index -> DMA'd once for the stack
    sq = x.shape[0]

    # Causal mask, hoisted once per layer (identical for every head).
    row = jax.lax.broadcasted_iota(jnp.int32, (sq, sq), 0)
    col = jax.lax.broadcasted_iota(jnp.int32, (sq, sq), 1)
    causal = col > row

    x = x + _mha(x, x, x, wq1[...], wk1[...], wv1[...], wo1[...], bo1[...], mask=causal)
    x = _layernorm(x, g1[...], b1[...])
    x = x + _mha(x, y, y, wq2[...], wk2[...], wv2[...], wo2[...], bo2[...])
    x = _layernorm(x, g2[...], b2[...])
    x = x + _ffn(x, w1[...], bf1[...], w2[...], bf2[...])
    x = _layernorm(x, g3[...], b3[...])
    out_ref[...] = x


# ----------------------------------------------------------------------------
# pallas_call wrappers
# ----------------------------------------------------------------------------
_ENC_KEYS = ("wq", "wk", "wv", "wo", "bo", "g1", "b1",
             "w1", "bf1", "w2", "bf2", "g2", "b2")
_DEC_KEYS = ("wq1", "wk1", "wv1", "wo1", "bo1", "g1", "b1",
             "wq2", "wk2", "wv2", "wo2", "bo2", "g2", "b2",
             "w1", "bf1", "w2", "bf2", "g3", "b3")


def _act_spec(shape):
    # Full-array block, constant block index -> loaded once / resident across layers.
    return pl.BlockSpec(shape, lambda l: (0, 0))


def _layer_spec(a):
    # Per-layer slice of a depth-stacked parameter; leading dim squeezed away.
    zeros = (0,) * (a.ndim - 1)
    return pl.BlockSpec((None,) + tuple(a.shape[1:]), lambda l: (l,) + zeros)


def _stack_cost(stacked, keys, sq, sk, d_model, n_attn, depth, num_heads):
    mm_attn = 8 * sq * d_model * d_model + 4 * sq * sk * d_model
    mm_ffn = 16 * sq * d_model * d_model
    flops = depth * (n_attn * mm_attn + mm_ffn)
    transcendentals = depth * (n_attn * (num_heads * sq * sk + sq) + 3 * sq)
    weight_bytes = sum(int(stacked[k].size) * stacked[k].dtype.itemsize for k in keys)
    act_bytes = (3 + n_attn) * sq * d_model * 4
    return pl.CostEstimate(flops=int(flops), transcendentals=int(transcendentals),
                           bytes_accessed=int(weight_bytes + act_bytes))


def encoder_stack(x, p):
    depth, num_heads = p["wq"].shape[0], p["wq"].shape[1]
    seq, d_model = x.shape
    return pl.pallas_call(
        _encoder_stack_kernel,
        grid=(depth,),
        in_specs=[_act_spec((seq, d_model))] + [_layer_spec(p[k]) for k in _ENC_KEYS],
        out_specs=_act_spec((seq, d_model)),
        out_shape=jax.ShapeDtypeStruct((seq, d_model), jnp.float32),
        compiler_params=pltpu.CompilerParams(
            dimension_semantics=("arbitrary",),      # layer l+1 depends on layer l
            vmem_limit_bytes=32 * 1024 * 1024),
        cost_estimate=_stack_cost(p, _ENC_KEYS, seq, seq, d_model, 1, depth, num_heads),
    )(x, *(p[k] for k in _ENC_KEYS))


def decoder_stack(x, y, p):
    depth, num_heads = p["wq1"].shape[0], p["wq1"].shape[1]
    sq, d_model = x.shape
    sk = y.shape[0]
    return pl.pallas_call(
        _decoder_stack_kernel,
        grid=(depth,),
        in_specs=[_act_spec((sq, d_model)), _act_spec((sk, d_model))]
                 + [_layer_spec(p[k]) for k in _DEC_KEYS],
        out_specs=_act_spec((sq, d_model)),
        out_shape=jax.ShapeDtypeStruct((sq, d_model), jnp.float32),
        compiler_params=pltpu.CompilerParams(
            dimension_semantics=("arbitrary",),
            vmem_limit_bytes=32 * 1024 * 1024),
        cost_estimate=_stack_cost(p, _DEC_KEYS, sq, sk, d_model, 2, depth, num_heads),
    )(x, y, *(p[k] for k in _DEC_KEYS))


# ----------------------------------------------------------------------------
# Plain-JAX glue: embeddings, positional encoding, parameter init / stacking
# ----------------------------------------------------------------------------
def positional_encoding(seq_len, d_model):
    # TODO(synk): `positional_encoding` is not provided in the source; standard sinusoidal used.
    pos = jnp.arange(seq_len, dtype=jnp.float32)[:, None]
    i = jnp.arange(d_model)[None, :]
    angle = pos / jnp.power(10000.0, (2 * (i // 2)).astype(jnp.float32) / d_model)
    return jnp.where(i % 2 == 0, jnp.sin(angle), jnp.cos(angle)).astype(jnp.float32)


def _init_mha(key, d_model, scale=0.05):
    ks = jax.random.split(key, 5)
    return dict(
        wq=jax.random.normal(ks[0], (d_model, d_model), jnp.float32) * scale,
        wk=jax.random.normal(ks[1], (d_model, d_model), jnp.float32) * scale,
        wv=jax.random.normal(ks[2], (d_model, d_model), jnp.float32) * scale,
        wo=jax.random.normal(ks[3], (d_model, d_model), jnp.float32) * scale,
        bo=jax.random.normal(ks[4], (1, d_model), jnp.float32) * scale,
    )


def _init_ffn(key, d_model, scale=0.05):
    ks = jax.random.split(key, 4)
    return dict(
        w1=jax.random.normal(ks[0], (d_model, 4 * d_model), jnp.float32) * scale,
        bf1=jax.random.normal(ks[1], (1, 4 * d_model), jnp.float32) * scale,
        w2=jax.random.normal(ks[2], (4 * d_model, d_model), jnp.float32) * scale,
        bf2=jax.random.normal(ks[3], (1, d_model), jnp.float32) * scale,
    )


def _ln_params(d_model):
    return jnp.ones((1, d_model), jnp.float32), jnp.zeros((1, d_model), jnp.float32)


def init_encoder_layer(key, d_model):
    k1, k2 = jax.random.split(key)
    p = {}
    p.update(_init_mha(k1, d_model))
    p.update(_init_ffn(k2, d_model))
    p["g1"], p["b1"] = _ln_params(d_model)
    p["g2"], p["b2"] = _ln_params(d_model)
    return p


def init_decoder_layer(key, d_model):
    k1, k2, k3 = jax.random.split(key, 3)
    p = {k + "1": v for k, v in _init_mha(k1, d_model).items()}
    p.update({k + "2": v for k, v in _init_mha(k2, d_model).items()})
    p.update(_init_ffn(k3, d_model))
    p["g1"], p["b1"] = _ln_params(d_model)
    p["g2"], p["b2"] = _ln_params(d_model)
    p["g3"], p["b3"] = _ln_params(d_model)
    return p


def _split_heads_in(w, num_heads):
    # (d_model, d_model), head h in columns [h*dh, (h+1)*dh) -> (H, d_model, d_head)
    d_model = w.shape[0]
    dh = d_model // num_heads
    return jnp.transpose(w.reshape(d_model, num_heads, dh), (1, 0, 2))


def _split_heads_out(w, num_heads):
    # proj weight (d_model, d_model), input rows = concatenated head chunks -> (H, d_head, d_model)
    d_model = w.shape[1]
    dh = w.shape[0] // num_heads
    return w.reshape(num_heads, dh, d_model)


def _stack(layers, key, fn=lambda a: a, dtype=None):
    a = jnp.stack([fn(p[key]) for p in layers])
    return a.astype(dtype) if dtype is not None else a


def _stack_encoder_params(layers, num_heads):
    bf = jnp.bfloat16
    split_in = lambda w: _split_heads_in(w, num_heads)
    split_out = lambda w: _split_heads_out(w, num_heads)
    return {
        "wq": _stack(layers, "wq", split_in, bf),
        "wk": _stack(layers, "wk", split_in, bf),
        "wv": _stack(layers, "wv", split_in, bf),
        "wo": _stack(layers, "wo", split_out, bf),
        "bo": _stack(layers, "bo"),
        "g1": _stack(layers, "g1"), "b1": _stack(layers, "b1"),
        "w1": _stack(layers, "w1", dtype=bf), "bf1": _stack(layers, "bf1"),
        "w2": _stack(layers, "w2", dtype=bf), "bf2": _stack(layers, "bf2"),
        "g2": _stack(layers, "g2"), "b2": _stack(layers, "b2"),
    }


def _stack_decoder_params(layers, num_heads):
    bf = jnp.bfloat16
    split_in = lambda w: _split_heads_in(w, num_heads)
    split_out = lambda w: _split_heads_out(w, num_heads)
    out = {}
    for sfx in ("1", "2"):
        out["wq" + sfx] = _stack(layers, "wq" + sfx, split_in, bf)
        out["wk" + sfx] = _stack(layers, "wk" + sfx, split_in, bf)
        out["wv" + sfx] = _stack(layers, "wv" + sfx, split_in, bf)
        out["wo" + sfx] = _stack(layers, "wo" + sfx, split_out, bf)
        out["bo" + sfx] = _stack(layers, "bo" + sfx)
    for k in ("g1", "b1", "g2", "b2", "g3", "b3", "bf1", "bf2"):
        out[k] = _stack(layers, k)
    out["w1"] = _stack(layers, "w1", dtype=bf)
    out["w2"] = _stack(layers, "w2", dtype=bf)
    return out


def init_transformers(key, encoder_depth, decoder_depth, enc_heads, dec_heads,
                      d_model, vocab_size):
    keys = jax.random.split(key, encoder_depth + decoder_depth + 1)
    enc_layers = [init_encoder_layer(keys[1 + i], d_model) for i in range(encoder_depth)]
    dec_layers = [init_decoder_layer(keys[1 + encoder_depth + i], d_model)
                  for i in range(decoder_depth)]
    return dict(
        embed=jax.random.normal(keys[0], (vocab_size, d_model), jnp.float32) * 0.05,
        enc=_stack_encoder_params(enc_layers, enc_heads),
        dec=_stack_decoder_params(dec_layers, dec_heads),
    )


def transformers_forward(params, src_tokens, tgt_tokens, train=False):
    E = params["embed"]
    d_model = E.shape[1]

    # encode(src): one fused pallas_call over the whole encoder stack.
    src_emb = E[src_tokens] + positional_encoding(src_tokens.shape[0], d_model)
    enc_output = encoder_stack(src_emb, params["enc"])

    # decoder stack on tgt: one fused pallas_call, enc_output loaded into VMEM once.
    tgt_emb = E[tgt_tokens] + positional_encoding(tgt_tokens.shape[0], d_model)
    dec_output = decoder_stack(tgt_emb, enc_output, params["dec"])

    # TODO(synk): `Embeddings.encode/decode` is not provided in the source; we use a
    # deterministic embedding table with tied-weight logits for decode.
    logits = dec_output[-1] @ E.T
    if train:
        return jax.nn.softmax(logits)
    return jnp.argmax(logits)


# ----------------------------------------------------------------------------
if __name__ == "__main__":
    D_MODEL = 32
    VOCAB = 50
    WINDOW = 8          # seq length for both src and tgt
    ENC_DEPTH = 2
    DEC_DEPTH = 2
    ENC_HEADS = 2
    DEC_HEADS = 2

    root = jax.random.PRNGKey(0)
    kp, ks, kt = jax.random.split(root, 3)
    params = init_transformers(kp, ENC_DEPTH, DEC_DEPTH, ENC_HEADS, DEC_HEADS,
                               D_MODEL, VOCAB)

    src = jax.random.randint(ks, (WINDOW,), 0, VOCAB)
    tgt = jax.random.randint(kt, (WINDOW,), 0, VOCAB)

    probs = transformers_forward(params, src, tgt, train=True)
    jax.block_until_ready(probs)
    assert probs.shape == (VOCAB,)
    print("KERNEL_OK")
</pallas_src>

<mosaic_0001>
module attributes {stable_mosaic.version = 11 : i64} {
  func.func @_encoder_stack_kernel(%arg0: i32, %arg1: memref<8x32xf32, #tpu.memory_space<vmem>>, %arg2: memref<1x2x32x16xbf16, #tpu.memory_space<vmem>>, %arg3: memref<1x2x32x16xbf16, #tpu.memory_space<vmem>>, %arg4: memref<1x2x32x16xbf16, #tpu.memory_space<vmem>>, %arg5: memref<1x2x16x32xbf16, #tpu.memory_space<vmem>>, %arg6: memref<1x1x32xf32, #tpu.memory_space<vmem>>, %arg7: memref<1x1x32xf32, #tpu.memory_space<vmem>>, %arg8: memref<1x1x32xf32, #tpu.memory_space<vmem>>, %arg9: memref<1x32x128xbf16, #tpu.memory_space<vmem>>, %arg10: memref<1x1x128xf32, #tpu.memory_space<vmem>>, %arg11: memref<1x128x32xbf16, #tpu.memory_space<vmem>>, %arg12: memref<1x1x32xf32, #tpu.memory_space<vmem>>, %arg13: memref<1x1x32xf32, #tpu.memory_space<vmem>>, %arg14: memref<1x1x32xf32, #tpu.memory_space<vmem>>, %arg15: memref<8x32xf32, #tpu.memory_space<vmem>>) attributes {dimension_semantics = [#tpu.dimension_semantics<arbitrary>], iteration_bounds = array<i64: 2>, scalar_prefetch = 0 : i64, scratch_operands = 0 : i64, tpu.core_type = #tpu.core_type<tc>, window_params = [{pipeline_mode = #tpu.pipeline_mode<synchronous>, transform_indices = @transform_0, window_bounds = array<i64: 8, 32>}, {transform_indices = @transform_1, window_bounds = array<i64: 1, 2, 32, 16>}, {transform_indices = @transform_2, window_bounds = array<i64: 1, 2, 32, 16>}, {transform_indices = @transform_3, window_bounds = array<i64: 1, 2, 32, 16>}, {transform_indices = @transform_4, window_bounds = array<i64: 1, 2, 16, 32>}, {transform_indices = @transform_5, window_bounds = array<i64: 1, 1, 32>}, {transform_indices = @transform_6, window_bounds = array<i64: 1, 1, 32>}, {transform_indices = @transform_7, window_bounds = array<i64: 1, 1, 32>}, {transform_indices = @transform_8, window_bounds = array<i64: 1, 32, 128>}, {transform_indices = @transform_9, window_bounds = array<i64: 1, 1, 128>}, {transform_indices = @transform_10, window_bounds = array<i64: 1, 128, 32>}, {transform_indices = @transform_11, window_bounds = array<i64: 1, 1, 32>}, {transform_indices = @transform_12, window_bounds = array<i64: 1, 1, 32>}, {transform_indices = @transform_13, window_bounds = array<i64: 1, 1, 32>}, {pipeline_mode = #tpu.pipeline_mode<synchronous>, transform_indices = @transform_14, window_bounds = array<i64: 8, 32>}]} {
    %c0_i32 = arith.constant 0 : i32
    %0 = arith.cmpi eq, %arg0, %c0_i32 : i32
    %1 = arith.extui %0 : i1 to i32
    %c0_i32_0 = arith.constant 0 : i32
    %2 = arith.cmpi ne, %1, %c0_i32_0 : i32
    scf.if %2 {
      %c0_69 = arith.constant 0 : index
      %c0_70 = arith.constant 0 : index
      %122 = vector.load %arg1[%c0_69, %c0_70] : memref<8x32xf32, #tpu.memory_space<vmem>>, vector<8x32xf32>
      %c0_71 = arith.constant 0 : index
      %c0_72 = arith.constant 0 : index
      %123 = vector.load %arg15[%c0_71, %c0_72] : memref<8x32xf32, #tpu.memory_space<vmem>>, vector<8x32xf32>
      tpu.vector_store %arg15[%c0_71, %c0_72], %122 {strides = array<i32>} : memref<8x32xf32, #tpu.memory_space<vmem>>, vector<8x32xf32>,
    } else {
    }
    %c0 = arith.constant 0 : index
    %c0_1 = arith.constant 0 : index
    %3 = vector.load %arg15[%c0, %c0_1] : memref<8x32xf32, #tpu.memory_space<vmem>>, vector<8x32xf32>
    %c0_2 = arith.constant 0 : index
    %c0_3 = arith.constant 0 : index
    %c0_4 = arith.constant 0 : index
    %c0_5 = arith.constant 0 : index
    %4 = vector.load %arg2[%c0_2, %c0_3, %c0_4, %c0_5] : memref<1x2x32x16xbf16, #tpu.memory_space<vmem>>, vector<1x2x32x16xbf16>
    %5 = vector.shape_cast %4 : vector<1x2x32x16xbf16> to vector<2x32x16xbf16>
    %c0_6 = arith.constant 0 : index
    %c0_7 = arith.constant 0 : index
    %c0_8 = arith.constant 0 : index
    %c0_9 = arith.constant 0 : index
    %6 = vector.load %arg3[%c0_6, %c0_7, %c0_8, %c0_9] : memref<1x2x32x16xbf16, #tpu.memory_space<vmem>>, vector<1x2x32x16xbf16>
    %7 = vector.shape_cast %6 : vector<1x2x32x16xbf16> to vector<2x32x16xbf16>
    %c0_10 = arith.constant 0 : index
    %c0_11 = arith.constant 0 : index
    %c0_12 = arith.constant 0 : index
    %c0_13 = arith.constant 0 : index
    %8 = vector.load %arg4[%c0_10, %c0_11, %c0_12, %c0_13] : memref<1x2x32x16xbf16, #tpu.memory_space<vmem>>, vector<1x2x32x16xbf16>
    %9 = vector.shape_cast %8 : vector<1x2x32x16xbf16> to vector<2x32x16xbf16>
    %c0_14 = arith.constant 0 : index
    %c0_15 = arith.constant 0 : index
    %c0_16 = arith.constant 0 : index
    %c0_17 = arith.constant 0 : index
    %10 = vector.load %arg5[%c0_14, %c0_15, %c0_16, %c0_17] : memref<1x2x16x32xbf16, #tpu.memory_space<vmem>>, vector<1x2x16x32xbf16>
    %11 = vector.shape_cast %10 : vector<1x2x16x32xbf16> to vector<2x16x32xbf16>
    %c0_18 = arith.constant 0 : index
    %c0_19 = arith.constant 0 : index
    %c0_20 = arith.constant 0 : index
    %12 = vector.load %arg6[%c0_18, %c0_19, %c0_20] : memref<1x1x32xf32, #tpu.memory_space<vmem>>, vector<1x1x32xf32>
    %13 = vector.shape_cast %12 : vector<1x1x32xf32> to vector<1x32xf32>
    %14 = arith.truncf %3 : vector<8x32xf32> to vector<8x32xbf16>
    %15 = vector.shape_cast %14 : vector<8x32xbf16> to vector<1x8x32xbf16>
    %16 = vector.broadcast %15 : vector<1x8x32xbf16> to vector<2x8x32xbf16>
    %17 = arith.truncf %3 : vector<8x32xf32> to vector<8x32xbf16>
    %18 = vector.shape_cast %17 : vector<8x32xbf16> to vector<1x8x32xbf16>
    %19 = vector.broadcast %18 : vector<1x8x32xbf16> to vector<2x8x32xbf16>
    %20 = arith.truncf %3 : vector<8x32xf32> to vector<8x32xbf16>
    %21 = vector.shape_cast %20 : vector<8x32xbf16> to vector<1x8x32xbf16>
    %22 = vector.broadcast %21 : vector<1x8x32xbf16> to vector<2x8x32xbf16>
    "tpu.trace_start"() <{level = 10 : i32, message = "hsd,hdf->hsf"}> : () -> ()
    %cst = arith.constant dense<0.000000e+00> : vector<2x8x16xf32>
    %23 = tpu.matmul %16, %5, %cst {dimension_numbers = #tpu.dot_dimension_numbers<[2], [1], [1], [2], [0, 0, 0, 1, 1, 2], [0], [0]>} : vector<2x8x32xbf16>, vector<2x32x16xbf16>, vector<2x8x16xf32> -> vector<2x8x16xf32>
    %cst_21 = arith.constant dense<0.000000e+00> : vector<2x8x16xf32>
    %24 = tpu.matmul %19, %7, %cst_21 {dimension_numbers = #tpu.dot_dimension_numbers<[2], [1], [1], [2], [0, 0, 0, 1, 1, 2], [0], [0]>} : vector<2x8x32xbf16>, vector<2x32x16xbf16>, vector<2x8x16xf32> -> vector<2x8x16xf32>
    %cst_22 = arith.constant dense<0.000000e+00> : vector<2x8x16xf32>
    %25 = tpu.matmul %22, %9, %cst_22 {dimension_numbers = #tpu.dot_dimension_numbers<[2], [1], [1], [2], [0, 0, 0, 1, 1, 2], [0], [0]>} : vector<2x8x32xbf16>, vector<2x32x16xbf16>, vector<2x8x16xf32> -> vector<2x8x16xf32>
    "tpu.trace_stop"() : () -> ()
    %26 = arith.truncf %23 : vector<2x8x16xf32> to vector<2x8x16xbf16>
    %27 = arith.truncf %24 : vector<2x8x16xf32> to vector<2x8x16xbf16>
    "tpu.trace_start"() <{level = 10 : i32, message = "hqf,hkf->hqk"}> : () -> ()
    %cst_23 = arith.constant dense<0.000000e+00> : vector<2x8x8xf32>
    %28 = tpu.matmul %26, %27, %cst_23 {dimension_numbers = #tpu.dot_dimension_numbers<[2], [2], [1], [1], [0, 0, 0, 1, 1, 1], [0], [0]>} : vector<2x8x16xbf16>, vector<2x8x16xbf16>, vector<2x8x8xf32> -> vector<2x8x8xf32>
    "tpu.trace_stop"() : () -> ()
    %cst_24 = arith.constant 2.500000e-01 : f32
    %29 = vector.broadcast %cst_24 : f32 to vector<2x8x8xf32>
    %30 = arith.mulf %28, %29 : vector<2x8x8xf32>
    %cst_25 = arith.constant dense<0xFF800000> : vector<2x8xf32>
    %31 = vector.multi_reduction <maximumf>, %30, %cst_25 [1] : vector<2x8x8xf32> to vector<2x8xf32>
    %32 = vector.shape_cast %31 : vector<2x8xf32> to vector<2x1x8xf32>
    %33 = vector.broadcast %32 : vector<2x1x8xf32> to vector<2x8x8xf32>
    %34 = arith.subf %30, %33 : vector<2x8x8xf32>
    %35 = math.exp %34 : vector<2x8x8xf32>
    %cst_26 = arith.constant dense<0.000000e+00> : vector<2x8xf32>
    %36 = vector.multi_reduction <add>, %35, %cst_26 [1] : vector<2x8x8xf32> to vector<2x8xf32>
    %37 = vector.shape_cast %36 : vector<2x8xf32> to vector<2x1x8xf32>
    %38 = tpu.reciprocal %37 {approx = true} : vector<2x1x8xf32> -> vector<2x1x8xf32>
    %39 = vector.broadcast %38 : vector<2x1x8xf32> to vector<2x8x8xf32>
    %40 = arith.mulf %35, %39 : vector<2x8x8xf32>
    %41 = arith.truncf %40 : vector<2x8x8xf32> to vector<2x8x8xbf16>
    %42 = arith.truncf %25 : vector<2x8x16xf32> to vector<2x8x16xbf16>
    "tpu.trace_start"() <{level = 10 : i32, message = "hqk,hkf->hqf"}> : () -> ()
    %cst_27 = arith.constant dense<0.000000e+00> : vector<2x8x16xf32>
    %43 = tpu.matmul %41, %42, %cst_27 {dimension_numbers = #tpu.dot_dimension_numbers<[2], [1], [1], [2], [0, 0, 0, 1, 1, 2], [0], [0]>} : vector<2x8x8xbf16>, vector<2x8x16xbf16>, vector<2x8x16xf32> -> vector<2x8x16xf32>
    "tpu.trace_stop"() : () -> ()
    %44 = arith.truncf %43 : vector<2x8x16xf32> to vector<2x8x16xbf16>
    "tpu.trace_start"() <{level = 10 : i32, message = "hqf,hfd->hqd"}> : () -> ()
    %cst_28 = arith.constant dense<0.000000e+00> : vector<2x8x32xf32>
    %45 = tpu.matmul %44, %11, %cst_28 {dimension_numbers = #tpu.dot_dimension_numbers<[2], [1], [1], [2], [0, 0, 0, 1, 1, 2], [0], [0]>} : vector<2x8x16xbf16>, vector<2x16x32xbf16>, vector<2x8x32xf32> -> vector<2x8x32xf32>
    "tpu.trace_stop"() : () -> ()
    %cst_29 = arith.constant dense<0.000000e+00> : vector<8x32xf32>
    %46 = vector.multi_reduction <add>, %45, %cst_29 [0] : vector<2x8x32xf32> to vector<8x32xf32>
    %47 = vector.broadcast %13 : vector<1x32xf32> to vector<8x32xf32>
    %48 = arith.addf %46, %47 : vector<8x32xf32>
    %49 = arith.addf %3, %48 : vector<8x32xf32>
    %c0_30 = arith.constant 0 : index
    %c0_31 = arith.constant 0 : index
    %c0_32 = arith.constant 0 : index
    %50 = vector.load %arg7[%c0_30, %c0_31, %c0_32] : memref<1x1x32xf32, #tpu.memory_space<vmem>>, vector<1x1x32xf32>
    %51 = vector.shape_cast %50 : vector<1x1x32xf32> to vector<1x32xf32>
    %c0_33 = arith.constant 0 : index
    %c0_34 = arith.constant 0 : index
    %c0_35 = arith.constant 0 : index
    %52 = vector.load %arg8[%c0_33, %c0_34, %c0_35] : memref<1x1x32xf32, #tpu.memory_space<vmem>>, vector<1x1x32xf32>
    %53 = vector.shape_cast %52 : vector<1x1x32xf32> to vector<1x32xf32>
    %cst_36 = arith.constant dense<0.000000e+00> : vector<8xf32>
    %54 = vector.multi_reduction <add>, %49, %cst_36 [1] : vector<8x32xf32> to vector<8xf32>
    %55 = vector.shape_cast %54 : vector<8xf32> to vector<8x1xf32>
    %cst_37 = arith.constant 3.200000e+01 : f32
    %56 = vector.broadcast %cst_37 : f32 to vector<8x1xf32>
    %57 = arith.divf %55, %56 : vector<8x1xf32>
    %58 = vector.broadcast %57 : vector<8x1xf32> to vector<8x32xf32>
    %59 = arith.subf %49, %58 : vector<8x32xf32>
    %60 = arith.mulf %59, %59 : vector<8x32xf32>
    %cst_38 = arith.constant dense<0.000000e+00> : vector<8xf32>
    %61 = vector.multi_reduction <add>, %60, %cst_38 [1] : vector<8x32xf32> to vector<8xf32>
    %62 = vector.shape_cast %61 : vector<8xf32> to vector<8x1xf32>
    %cst_39 = arith.constant 0.0322580636 : f32
    %63 = vector.broadcast %cst_39 : f32 to vector<8x1xf32>
    %64 = arith.mulf %62, %63 : vector<8x1xf32>
    %65 = vector.broadcast %57 : vector<8x1xf32> to vector<8x32xf32>
    %66 = arith.subf %49, %65 : vector<8x32xf32>
    %67 = vector.broadcast %51 : vector<1x32xf32> to vector<8x32xf32>
    %68 = arith.mulf %66, %67 : vector<8x32xf32>
    %cst_40 = arith.constant 9.99999996E-13 : f32
    %69 = vector.broadcast %cst_40 : f32 to vector<8x1xf32>
    %70 = arith.addf %64, %69 : vector<8x1xf32>
    %71 = math.rsqrt %70 : vector<8x1xf32>
    %72 = vector.broadcast %71 : vector<8x1xf32> to vector<8x32xf32>
    %73 = arith.mulf %68, %72 : vector<8x32xf32>
    %74 = vector.broadcast %53 : vector<1x32xf32> to vector<8x32xf32>
    %75 = arith.addf %73, %74 : vector<8x32xf32>
    %c0_41 = arith.constant 0 : index
    %c0_42 = arith.constant 0 : index
    %c0_43 = arith.constant 0 : index
    %76 = vector.load %arg9[%c0_41, %c0_42, %c0_43] : memref<1x32x128xbf16, #tpu.memory_space<vmem>>, vector<1x32x128xbf16>
    %77 = vector.shape_cast %76 : vector<1x32x128xbf16> to vector<32x128xbf16>
    %c0_44 = arith.constant 0 : index
    %c0_45 = arith.constant 0 : index
    %c0_46 = arith.constant 0 : index
    %78 = vector.load %arg10[%c0_44, %c0_45, %c0_46] : memref<1x1x128xf32, #tpu.memory_space<vmem>>, vector<1x1x128xf32>
    %79 = vector.shape_cast %78 : vector<1x1x128xf32> to vector<1x128xf32>
    %c0_47 = arith.constant 0 : index
    %c0_48 = arith.constant 0 : index
    %c0_49 = arith.constant 0 : index
    %80 = vector.load %arg11[%c0_47, %c0_48, %c0_49] : memref<1x128x32xbf16, #tpu.memory_space<vmem>>, vector<1x128x32xbf16>
    %81 = vector.shape_cast %80 : vector<1x128x32xbf16> to vector<128x32xbf16>
    %c0_50 = arith.constant 0 : index
    %c0_51 = arith.constant 0 : index
    %c0_52 = arith.constant 0 : index
    %82 = vector.load %arg12[%c0_50, %c0_51, %c0_52] : memref<1x1x32xf32, #tpu.memory_space<vmem>>, vector<1x1x32xf32>
    %83 = vector.shape_cast %82 : vector<1x1x32xf32> to vector<1x32xf32>
    %84 = arith.truncf %75 : vector<8x32xf32> to vector<8x32xbf16>
    %cst_53 = arith.constant dense<0.000000e+00> : vector<8x128xf32>
    %85 = tpu.matmul %84, %77, %cst_53 {dimension_numbers = #tpu.dot_dimension_numbers<[1], [0], [0], [1], [0, 0, 1, 1], [], []>} : vector<8x32xbf16>, vector<32x128xbf16>, vector<8x128xf32> -> vector<8x128xf32>
    %86 = vector.broadcast %79 : vector<1x128xf32> to vector<8x128xf32>
    %87 = arith.addf %85, %86 : vector<8x128xf32>
    %cst_54 = arith.constant 0.000000e+00 : f32
    %88 = vector.broadcast %cst_54 : f32 to vector<8x128xf32>
    %89 = arith.maximumf %87, %88 : vector<8x128xf32>
    %90 = arith.truncf %89 : vector<8x128xf32> to vector<8x128xbf16>
    %cst_55 = arith.constant dense<0.000000e+00> : vector<8x32xf32>
    %91 = tpu.matmul %90, %81, %cst_55 {dimension_numbers = #tpu.dot_dimension_numbers<[1], [0], [0], [1], [0, 0, 1, 1], [], []>} : vector<8x128xbf16>, vector<128x32xbf16>, vector<8x32xf32> -> vector<8x32xf32>
    %92 = vector.broadcast %83 : vector<1x32xf32> to vector<8x32xf32>
    %93 = arith.addf %91, %92 : vector<8x32xf32>
    %94 = arith.addf %75, %93 : vector<8x32xf32>
    %c0_56 = arith.constant 0 : index
    %c0_57 = arith.constant 0 : index
    %c0_58 = arith.constant 0 : index
    %95 = vector.load %arg13[%c0_56, %c0_57, %c0_58] : memref<1x1x32xf32, #tpu.memory_space<vmem>>, vector<1x1x32xf32>
    %96 = vector.shape_cast %95 : vector<1x1x32xf32> to vector<1x32xf32>
    %c0_59 = arith.constant 0 : index
    %c0_60 = arith.constant 0 : index
    %c0_61 = arith.constant 0 : index
    %97 = vector.load %arg14[%c0_59, %c0_60, %c0_61] : memref<1x1x32xf32, #tpu.memory_space<vmem>>, vector<1x1x32xf32>
    %98 = vector.shape_cast %97 : vector<1x1x32xf32> to vector<1x32xf32>
    %cst_62 = arith.constant dense<0.000000e+00> : vector<8xf32>
    %99 = vector.multi_reduction <add>, %94, %cst_62 [1] : vector<8x32xf32> to vector<8xf32>
    %100 = vector.shape_cast %99 : vector<8xf32> to vector<8x1xf32>
    %cst_63 = arith.constant 3.200000e+01 : f32
    %101 = vector.broadcast %cst_63 : f32 to vector<8x1xf32>
    %102 = arith.divf %100, %101 : vector<8x1xf32>
    %103 = vector.broadcast %102 : vector<8x1xf32> to vector<8x32xf32>
    %104 = arith.subf %94, %103 : vector<8x32xf32>
    %105 = arith.mulf %104, %104 : vector<8x32xf32>
    %cst_64 = arith.constant dense<0.000000e+00> : vector<8xf32>
    %106 = vector.multi_reduction <add>, %105, %cst_64 [1] : vector<8x32xf32> to vector<8xf32>
    %107 = vector.shape_cast %106 : vector<8xf32> to vector<8x1xf32>
    %cst_65 = arith.constant 0.0322580636 : f32
    %108 = vector.broadcast %cst_65 : f32 to vector<8x1xf32>
    %109 = arith.mulf %107, %108 : vector<8x1xf32>
    %110 = vector.broadcast %102 : vector<8x1xf32> to vector<8x32xf32>
    %111 = arith.subf %94, %110 : vector<8x32xf32>
    %112 = vector.broadcast %96 : vector<1x32xf32> to vector<8x32xf32>
    %113 = arith.mulf %111, %112 : vector<8x32xf32>
    %cst_66 = arith.constant 9.99999996E-13 : f32
    %114 = vector.broadcast %cst_66 : f32 to vector<8x1xf32>
    %115 = arith.addf %109, %114 : vector<8x1xf32>
    %116 = math.rsqrt %115 : vector<8x1xf32>
    %117 = vector.broadcast %116 : vector<8x1xf32> to vector<8x32xf32>
    %118 = arith.mulf %113, %117 : vector<8x32xf32>
    %119 = vector.broadcast %98 : vector<1x32xf32> to vector<8x32xf32>
    %120 = arith.addf %118, %119 : vector<8x32xf32>
    %c0_67 = arith.constant 0 : index
    %c0_68 = arith.constant 0 : index
    %121 = vector.load %arg15[%c0_67, %c0_68] : memref<8x32xf32, #tpu.memory_space<vmem>>, vector<8x32xf32>
    tpu.vector_store %arg15[%c0_67, %c0_68], %120 {strides = array<i32>} : memref<8x32xf32, #tpu.memory_space<vmem>>, vector<8x32xf32>,
    return
  }
  func.func @transform_0(%arg0: i32) -> (i32, i32) {
    %c0_i32 = arith.constant 0 : i32
    %c0_i32_0 = arith.constant 0 : i32
    %c0_i32_1 = arith.constant 0 : i32
    return %c0_i32, %c0_i32_0 : i32, i32
  }
  func.func @transform_1(%arg0: i32) -> (i32, i32, i32, i32) {
    %c0_i32 = arith.constant 0 : i32
    %c0_i32_0 = arith.constant 0 : i32
    %c0_i32_1 = arith.constant 0 : i32
    %c0_i32_2 = arith.constant 0 : i32
    return %arg0, %c0_i32, %c0_i32_0, %c0_i32_1 : i32, i32, i32, i32
  }
  func.func @transform_2(%arg0: i32) -> (i32, i32, i32, i32) {
    %c0_i32 = arith.constant 0 : i32
    %c0_i32_0 = arith.constant 0 : i32
    %c0_i32_1 = arith.constant 0 : i32
    %c0_i32_2 = arith.constant 0 : i32
    return %arg0, %c0_i32, %c0_i32_0, %c0_i32_1 : i32, i32, i32, i32
  }
  func.func @transform_3(%arg0: i32) -> (i32, i32, i32, i32) {
    %c0_i32 = arith.constant 0 : i32
    %c0_i32_0 = arith.constant 0 : i32
    %c0_i32_1 = arith.constant 0 : i32
    %c0_i32_2 = arith.constant 0 : i32
    return %arg0, %c0_i32, %c0_i32_0, %c0_i32_1 : i32, i32, i32, i32
  }
  func.func @transform_4(%arg0: i32) -> (i32, i32, i32, i32) {
    %c0_i32 = arith.constant 0 : i32
    %c0_i32_0 = arith.constant 0 : i32
    %c0_i32_1 = arith.constant 0 : i32
    %c0_i32_2 = arith.constant 0 : i32
    return %arg0, %c0_i32, %c0_i32_0, %c0_i32_1 : i32, i32, i32, i32
  }
  func.func @transform_5(%arg0: i32) -> (i32, i32, i32) {
    %c0_i32 = arith.constant 0 : i32
    %c0_i32_0 = arith.constant 0 : i32
    %c0_i32_1 = arith.constant 0 : i32
    return %arg0, %c0_i32, %c0_i32_0 : i32, i32, i32
  }
  func.func @transform_6(%arg0: i32) -> (i32, i32, i32) {
    %c0_i32 = arith.constant 0 : i32
    %c0_i32_0 = arith.constant 0 : i32
    %c0_i32_1 = arith.constant 0 : i32
    return %arg0, %c0_i32, %c0_i32_0 : i32, i32, i32
  }
  func.func @transform_7(%arg0: i32) -> (i32, i32, i32) {
    %c0_i32 = arith.constant 0 : i32
    %c0_i32_0 = arith.constant 0 : i32
    %c0_i32_1 = arith.constant 0 : i32
    return %arg0, %c0_i32, %c0_i32_0 : i32, i32, i32
  }
  func.func @transform_8(%arg0: i32) -> (i32, i32, i32) {
    %c0_i32 = arith.constant 0 : i32
    %c0_i32_0 = arith.constant 0 : i32
    %c0_i32_1 = arith.constant 0 : i32
    return %arg0, %c0_i32, %c0_i32_0 : i32, i32, i32
  }
  func.func @transform_9(%arg0: i32) -> (i32, i32, i32) {
    %c0_i32 = arith.constant 0 : i32
    %c0_i32_0 = arith.constant 0 : i32
    %c0_i32_1 = arith.constant 0 : i32
    return %arg0, %c0_i32, %c0_i32_0 : i32, i32, i32
  }
  func.func @transform_10(%arg0: i32) -> (i32, i32, i32) {
    %c0_i32 = arith.constant 0 : i32
    %c0_i32_0 = arith.constant 0 : i32
    %c0_i32_1 = arith.constant 0 : i32
    return %arg0, %c0_i32, %c0_i32_0 : i32, i32, i32
  }
  func.func @transform_11(%arg0: i32) -> (i32, i32, i32) {
    %c0_i32 = arith.constant 0 : i32
    %c0_i32_0 = arith.constant 0 : i32
    %c0_i32_1 = arith.constant 0 : i32
    return %arg0, %c0_i32, %c0_i32_0 : i32, i32, i32
  }
  func.func @transform_12(%arg0: i32) -> (i32, i32, i32) {
    %c0_i32 = arith.constant 0 : i32
    %c0_i32_0 = arith.constant 0 : i32
    %c0_i32_1 = arith.constant 0 : i32
    return %arg0, %c0_i32, %c0_i32_0 : i32, i32, i32
  }
  func.func @transform_13(%arg0: i32) -> (i32, i32, i32) {
    %c0_i32 = arith.constant 0 : i32
    %c0_i32_0 = arith.constant 0 : i32
    %c0_i32_1 = arith.constant 0 : i32
    return %arg0, %c0_i32, %c0_i32_0 : i32, i32, i32
  }
  func.func @transform_14(%arg0: i32) -> (i32, i32) {
    %c0_i32 = arith.constant 0 : i32
    %c0_i32_0 = arith.constant 0 : i32
    %c0_i32_1 = arith.constant 0 : i32
    return %c0_i32, %c0_i32_0 : i32, i32
  }
}

</mosaic_0001>

<bundles_post_ra>
// kernel: tpu_custom_call.1
= control target key start
LH: loop header
LB: loop body
LE: loop exit
PB: predicated region body
PF: predicated region fallthrough
CT: control target
= control target key end

     0   :  { %s1880_s0 = inlined_call_operand.vmem [shape: f32[8,32], index: 0, kind: input, shape index: {}]   ;;  %s1881_s1 = inlined_call_operand.vmem [shape: bf16[2,2,32,16], index: 1, kind: input, shape index: {}]   ;;  %s1882_s2 = inlined_call_operand.vmem [shape: bf16[2,2,32,16], index: 2, kind: input, shape index: {}]   ;;  %s1883_s3 = inlined_call_operand.vmem [shape: bf16[2,2,32,16], index: 3, kind: input, shape index: {}]   ;;  %s1884_s4 = inlined_call_operand.vmem [shape: bf16[2,2,16,32], index: 4, kind: input, shape index: {}]   ;;  %s1885_s5 = inlined_call_operand.vmem [shape: f32[2,1,32], index: 5, kind: input, shape index: {}]   ;;  %s1886_s6 = inlined_call_operand.vmem [shape: f32[2,1,32], index: 6, kind: input, shape index: {}]   ;;  %s1887_s7 = inlined_call_operand.vmem [shape: f32[2,1,32], index: 7, kind: input, shape index: {}]   ;;  %s1888_s8 = inlined_call_operand.vmem [shape: bf16[2,32,128], index: 8, kind: input, shape index: {}]   ;;  %s1889_s9 = inlined_call_operand.vmem [shape: f32[2,1,128], index: 9, kind: input, shape index: {}]   ;;  %s1890_s10 = inlined_call_operand.vmem [shape: bf16[2,128,32], index: 10, kind: input, shape index: {}]   ;;  %s1891_s11 = inlined_call_operand.vmem [shape: f32[2,1,32], index: 11, kind: input, shape index: {}]   ;;  %s1892_s12 = inlined_call_operand.vmem [shape: f32[2,1,32], index: 12, kind: input, shape index: {}]   ;;  %s1893_s13 = inlined_call_operand.vmem [shape: f32[2,1,32], index: 13, kind: input, shape index: {}]   ;;  %s1894_s14 = inlined_call_operand.hbm [shape: f32[8,32], index: 14, kind: output, shape index: {}]  }
   0x1   :  { %1897 = sst [smem:[#allocation7_spill]] %s1880_s0 }
   0x2   :  { %1898 = sst [smem:[#allocation8_spill]] %s1881_s1 }
   0x3   :  { %1899 = sst [smem:[#allocation9_spill]] %s1882_s2 }
   0x4   :  { %1900 = sst [smem:[#allocation10_spill]] %s1883_s3 }
   0x5   :  { %1901 = sst [smem:[#allocation11_spill]] %s1884_s4 }
   0x6   :  { %1902 = sst [smem:[#allocation12_spill]] %s1894_s14 }
   0x7   :  { %19 = vsyncpa [#allocation3], 0  ;;  %s1704_s29 = smov 0  }
   0x8 LB: > { %1903 = sst [smem:[#allocation5_spill]] %s1625_s29  ;;  %s1710_s30 = sadd.s32 4294967295, %s1625_s29   ;;  %s1625_s29 = sphi %s1704_s29, %s25_s29  }
   0x9   : > { %p1393_p0 = scmp.ge.s32.totalorder %s1625_s29, 1  ;;  %p514_p1 = scmp.lt.s32.totalorder %s1625_s29, 3 }
   0xb   : > { %p515_p2 = pnand %p1393_p0, %p514_p1 }
   0xd   : > { %518 = sbr.rel (%p515_p2) target bundleno = 1453 (0x5ad), region = 76 }
  0x12   : > { %p601_p3 = scmp.lt.s32.totalorder %s1710_s30, 1  ;;  %s1904_s1 = sld [smem:[#allocation8_spill]] }
  0x13   : > { %s1905_s2 = sld [smem:[#allocation9_spill]]  ;;  %p1406_p4 = scmp.ne.s32.totalorder %s1710_s30, 0 }
  0x14   : > { %s1716_s15 = scalar_select %p601_p3, %s1710_s30, 1 }
  0x15   : > { %s1907_s3 = sld [smem:[#allocation10_spill]] }
  0x16   : > { %s1520_s16 = sshll.u32 %s1716_s15, 5  ;;  %s1523_s17 = sshll.u32 %s1716_s15, 4 }
  0x17   : > { %s1908_s4 = sld [smem:[#allocation11_spill]]  ;;  %s1753_s25 = scalar_lea.vmem %s1888_s8, %s1523_s17 }
  0x18   : > { %s605_s20 = scalar_lea.vmem %s1904_s1, %s1520_s16  ;;  %s648_s24 = scalar_lea.vmem %s1892_s12, %s1716_s15 }
  0x19   : > { %s1726_s23 = scalar_lea.vmem %s1905_s2, %s1520_s16  ;;  %s645_s2 = scalar_lea.vmem %s1891_s11, %s1716_s15 }
  0x1a   : > { %1906 = sst [smem:[#allocation6_spill]] %s1726_s23  ;;  %s651_s21 = scalar_lea.vmem %s1893_s13, %s1716_s15 }
  0x1b   : > { %s1731_s26 = scalar_lea.vmem %s1907_s3, %s1520_s16  ;;  %s637_s3 = scalar_lea.vmem %s1889_s9, %s1716_s15 }
  0x1c   : > { %656 = sbr.rel (%p1406_p4) target bundleno = 36 (0x24), region = 80  ;;  %s1909_s0 = sld [smem:[#allocation7_spill]] (!%p1406_p4) }
  0x1d   : > { %s1736_s29 = scalar_lea.vmem %s1908_s4, %s1523_s17  ;;  %s1525_s4 = sshll.u32 %s1716_s15, 6 }
  0x1e   : > { %s1763_s18 = scalar_lea.vmem %s1890_s10, %s1525_s4 }
  0x21   : > { %vm658_vm0 = vcmask 261120  }
  0x22   : > { %v657_v0 = vld [vmem:[%s1909_s0] sm:$0xff] }
  0x23   : > { %659 = vst.msk [vmem:[#allocation2] sm:$0xff] %vm658_vm0, %v657_v0 }
  0x24 PF: > { %v1529_v1 = vld [vmem:[%s605_s20 + $0x18] sm:$0xff]  ;;  %s1910_s4 = sld [smem:[#allocation6_spill]]  ;;  %v1528_v3 = vld [vmem:[%s605_s20 + $0x10] sm:$0xff]  ;;  %v1527_v7 = vld [vmem:[%s605_s20 + $0x8] sm:$0xff]  ;;  %vm703_vm1 = vcmask 261120   ;;  %vm849_vm2 = vcmask 130048   ;;  %s1912_s14 = scalar_lea.vmem %s1886_s6, %s1716_s15 }
  0x25   : > { %738 = vmatpush.bf16.msra.mxu2 %v1529_v1  ;;  %v1526_v8 = vld [vmem:[%s605_s20] sm:$0xff]  ;;  %713 = vmatpush.bf16.msra.mxu0 %v1527_v7  ;;  %v1537_v11 = vld [vmem:[%s1731_s26 + $0x18] sm:$0xff]  ;;  %v1535_v12 = vld [vmem:[%s1731_s26 + $0x8] sm:$0xff]  ;;  %vm890_vm3 = vcmask 64512   ;;  %vm936_vm4 = vcmask 1043456   ;;  %s1913_s22 = scalar_lea.vmem %s1887_s7, %s1716_s15  ;;  %p1554_p5 = scmp.eq.s32.totalorder %s1710_s30, 1 }
  0x26   : > { %838 = vmatpush.bf16.msra.mxu1 %v1537_v11  ;;  %v1536_v14 = vld [vmem:[%s1731_s26 + $0x10] sm:$0xff]  ;;  %v1534_v15 = vld [vmem:[%s1731_s26] sm:$0xff]  ;;  %s1911_s26 = scalar_lea.vmem %s1885_s5, %s1716_s15 }
  0x29   : > { %739 = vmatpush.bf16.msra.mxu2 %v1528_v3  ;;  %714 = vmatpush.bf16.msra.mxu0 %v1526_v8 }
  0x2a   : > { %v1533_v2 = vld [vmem:[%s1910_s4 + $0x18] sm:$0xff]  ;;  %v1532_v4 = vld [vmem:[%s1910_s4 + $0x10] sm:$0xff]  ;;  %v1783_v5 = vld [vmem:[#allocation2] sm:$0xff]  ;;  %839 = vmatpush.bf16.msra.mxu1 %v1536_v14 }
  0x2b   : > { %788 = vmatpush.bf16.msra.mxu3 %v1533_v2  ;;  %v1531_v6 = vld [vmem:[%s1910_s4 + $0x8] sm:$0xff]  ;;  %v690_v9 = vpack.c.bf16 %v1783_v5, %v1783_v5  ;;  %v1530_v10 = vld [vmem:[%s1910_s4] sm:$0xff]  ;;  %s1628_s4 = smov [#allocation2]  }
  0x2c   : > { %s1225_s20 = sshll.u32 %s1628_s4, 4  ;;  %s1226_s20 = int_to_ptr.vmem [resolvable:$true] %s1225_s20 }
  0x2d   : > { %763 = vmatpush.bf16.msrb.mxu2 %v1531_v6  ;;  %1415 = vmatmul.msk.bf16.vlgmr.msra.gmra.mxu0 %vm703_vm1, %v690_v9 }
  0x2e   : > { %1424 = vmatmul.msk.bf16.vlgmr.msra.gmra.mxu2 %vm703_vm1, %v690_v9  ;;  %813 = vmatpush.bf16.msrb.mxu0 %v1535_v12 }
  0x2f   : > { %789 = vmatpush.bf16.msra.mxu3 %v1532_v4  ;;  %1460 = vmatmul.msk.bf16.vlgmr.msra.gmra.mxu1 %vm703_vm1, %v690_v9 }
  0x31   : > { %764 = vmatpush.bf16.msrb.mxu2 %v1530_v10 }
  0x32   : > { %1442 = vmatmul.msk.bf16.vlgmr.msra.gmra.mxu3 %vm703_vm1, %v690_v9  ;;  %814 = vmatpush.bf16.msrb.mxu0 %v1534_v15 }
  0x3d   : > { %1451 = vmatmul.msk.bf16.vlgmr.msrb.gmra.mxu0 %vm703_vm1, %v690_v9 }
  0x3e   : > { %1433 = vmatmul.msk.bf16.vlgmr.msrb.gmra.mxu2 %vm703_vm1, %v690_v9 }
  0xaa   : > { %v716_v13 = vpop.f32.mrf.mxu0 }
  0xab   : > { %v845_v27 = vpack.c.bf16 %v716_v13, %v716_v13 }
  0xac   : > { %v841_v38 = vpop.f32.mrf.mxu1 }
  0xad   : > { %v932_v39 = vpack.c.bf16 %v841_v38, %v841_v38 }
  0xaf   : > { %v957_v41 = vsel %vm936_vm4, %v932_v39, 0  ;;  %v1627_v39 = vmov 32.0  }
  0xb0   : > { %966 = vmatpush.bf16.msrb.mxu1 %v957_v41 }
  0xb1   : > { %v741_v16 = vpop.f32.mrf.mxu2 }
  0xb2   : > { %v718_v20 = vpop.f32.mrf.mxu0  ;;  %v846_v23 = vpack.c.bf16 %v741_v16, %v741_v16 }
  0xb3   : > { %v1539_v20 = vld [vmem:[%s1736_s29 + $0x8] sm:$0xff] }
  0xb4   : > { %v843_v49 = vpop.f32.mrf.mxu1 }
  0xb5   : > { %v791_v17 = vpop.f32.mrf.mxu3 }
  0xb6   : > { %v848_v18 = vpack.c.bf16 %v791_v17, %v791_v17 }
  0xb8   : > { %v873_v19 = vsel %vm849_vm2, %v848_v18, 0 }
  0xb9   : > { %882 = vmatpush.bf16.xpose.msrb.mxu3 %v873_v19  ;;  %v743_v21 = vpop.f32.mrf.mxu2 }
  0xba   : > { %v816_v48 = vpop.f32.mrf.mxu0  ;;  %v1538_v21 = vld [vmem:[%s1736_s29] sm:$0xff]  ;;  %s1914_s29 = sld [smem:[#allocation12_spill]] }
  0xbb   : > { %v931_v59 = vpack.c.bf16 %v816_v48, %v816_v48 }
  0xbd   : > { %v793_v22 = vpop.f32.mrf.mxu3  ;;  %v938_v62 = vsel %vm936_vm4, %v931_v59, 0 }
  0xbe   : > { %947 = vmatpush.bf16.msra.mxu0 %v938_v62 }
  0xc0   : > { %1462 = vmatmul.msk.bf16.vlgmr.msrb.gmra.mxu3 %vm849_vm2, %v846_v23 }
  0xc1   : > { %v766_v24 = vpop.f32.mrf.mxu2  ;;  %1012 = vmatpush.bf16.msra.mxu3 %v1539_v20 }
  0xc2   : > { %v847_v25 = vpack.c.bf16 %v766_v24, %v766_v24  ;;  %v818_v58 = vpop.f32.mrf.mxu0 }
  0xc3   : > { %v1546_v58 = vld [vmem:[%s1763_s18 + $0x20] sm:$0xff] }
  0xc4   : > { %v854_v26 = vsel %vm849_vm2, %v847_v25, 0 }
  0xc5   : > { %863 = vmatpush.bf16.xpose.msra.mxu2 %v854_v26 }
  0xc9   : > { %v768_v28 = vpop.f32.mrf.mxu2 }
  0xcc   : > { %1461 = vmatmul.msk.bf16.vlgmr.msra.gmra.mxu2 %vm849_vm2, %v845_v27 }
  0xcd   : > { %990 = vmatpush.bf16.msrb.mxu2 %v1538_v21 }
 0x143   : > { %v884_v29 = vpop.f32.mrf.mxu3 }
 0x144   : > { %v889_v30 = vmul.f32 0.25, %v884_v29 }
 0x146   : > { %v898_v31 = vsel %vm890_vm3, %v889_v30, -inf }
 0x147   : > { %v899_v32 = vrot.slane %v898_v31, 4 }
 0x149   : > { %v900_v33 = vmax.f32 %v898_v31, %v899_v32  ;;  %v1566_v31 = vld [vmem:[%s1911_s26] ss:$0 sm:$0xff] }
 0x14b   : > { %v901_v34 = vrot.slane %v900_v33, 2  ;;  %v886_v35 = vpop.f32.mrf.mxu3 }
 0x14d   : > { %v902_v36 = vmax.f32 %v900_v33, %v901_v34 }
 0x14f   : > { %v903_v37 = vrot.slane %v902_v36, 1  ;;  %v865_v43 = vpop.f32.mrf.mxu2 }
 0x150   : > { %v888_v44 = vmul.f32 0.25, %v865_v43 }
 0x151   : > { %v904_v40 = vmax.f32 %v902_v36, %v903_v37 }
 0x152   : > { %v891_v46 = vsel %vm890_vm3, %v888_v44, -inf }
 0x153   : > { %v906_v42 = vsub.f32 %v889_v30, %v904_v40  ;;  %v892_v47 = vrot.slane %v891_v46, 4 }
 0x155   : > { %v909_v45 = vmul.f32 1.442695, %v906_v42  ;;  %v893_v50 = vmax.f32 %v891_v46, %v892_v47 }
 0x157   : > { %1573 = vpow2.f32 %v909_v45  ;;  %v894_v51 = vrot.slane %v893_v50, 2  ;;  %v867_v52 = vpop.f32.mrf.mxu2 }
 0x158   : > { %v1549_v52 = vld [vmem:[%s1763_s18 + $0x38] sm:$0xff] }
 0x159   : > { %v895_v54 = vmax.f32 %v893_v50, %v894_v51  ;;  %v1541_v50 = vld [vmem:[%s1753_s25 + $0x8] sm:$0xff]  ;;  %v1540_v51 = vld [vmem:[%s1753_s25] sm:$0xff]  ;;  %1172 = vmatpush.bf16.msra.mxu1 %v1549_v52  ;;  %s1227_s25 = sshll.u32 %s1914_s29, 4  ;;  %s1228_s25 = int_to_ptr.hbm [resolvable:$true] %s1227_s25 }
 0x15a   : > { %1112 = vmatpush.bf16.msrb.mxu0 %v1541_v50 }
 0x15b   : > { %v896_v57 = vrot.slane %v895_v54, 1 }
 0x15d   : > { %v1574_v53 = vpop.eup %1573  ;;  %v897_v61 = vmax.f32 %v895_v54, %v896_v57  ;;  %v1547_v57 = vld [vmem:[%s1763_s18 + $0x28] sm:$0xff] }
 0x15e   : > { %v918_v55 = vsel %vm890_vm3, %v1574_v53, 0.0  ;;  %1113 = vmatpush.bf16.msrb.mxu0 %v1540_v51 }
 0x15f   : > { %v919_v56 = vrot.slane %v918_v55, 4  ;;  %v905_v0 = vsub.f32 %v888_v44, %v897_v61 }
 0x161   : > { %v920_v60 = vadd.f32 %v919_v56, %v918_v55  ;;  %v907_v2 = vmul.f32 1.442695, %v905_v0 }
 0x163   : > { %v921_v63 = vrot.slane %v920_v60, 2  ;;  %1575 = vpow2.f32 %v907_v2 }
 0x165   : > { %v922_v1 = vadd.f32 %v921_v63, %v920_v60  ;;  %v1545_v60 = vld [vmem:[%s1763_s18 + $0x18] sm:$0xff]  ;;  %v1544_v63 = vld [vmem:[%s1763_s18 + $0x10] sm:$0xff] }
 0x167   : > { %v923_v3 = vrot.slane %v922_v1, 1 }
 0x169   : > { %v924_v4 = vadd.f32 %v923_v3, %v922_v1  ;;  %v1576_v6 = vpop.eup %1575  ;;  %v1567_v1 = vld [vmem:[%s1912_s14] ss:$0 sm:$0xff] }
 0x16a   : > { %v911_v7 = vsel %vm890_vm3, %v1576_v6, 0.0 }
 0x16b   : > { %1577 = vrcp.f32 %v924_v4  ;;  %v912_v8 = vrot.slane %v911_v7, 4 }
 0x16d   : > { %v913_v10 = vadd.f32 %v912_v8, %v911_v7 }
 0x16f   : > { %v914_v12 = vrot.slane %v913_v10, 2 }
 0x171   : > { %v1578_v9 = vpop.eup %1577  ;;  %v915_v14 = vadd.f32 %v914_v12, %v913_v10  ;;  %v1542_v12 = vld [vmem:[%s1763_s18] sm:$0xff] }
 0x172   : > { %v928_v11 = vmul.f32 %v1578_v9, %v1574_v53  ;;  %v1548_v53 = vld [vmem:[%s1763_s18 + $0x30] sm:$0xff] }
 0x173   : > { %v916_v15 = vrot.slane %v915_v14, 1  ;;  %1173 = vmatpush.bf16.msra.mxu1 %v1548_v53 }
 0x174   : > { %v930_v13 = vpack.c.bf16 %v928_v11, %v928_v11  ;;  %v1543_v11 = vld [vmem:[%s1763_s18 + $0x8] sm:$0xff] }
 0x175   : > { %v917_v16 = vadd.f32 %v916_v15, %v915_v14 }
 0x176   : > { %1464 = vmatmul.msk.bf16.vlgmr.msrb.gmra.mxu1 %vm890_vm3, %v930_v13  ;;  %v1569_v13 = vld [vmem:[%s637_s3] ss:$0 sm:$0xff] }
 0x177   : > { %1579 = vrcp.f32 %v917_v16  ;;  %1174 = vmatpush.bf16.msra.mxu1 %v1547_v57 }
 0x178   : > { %1581 = vrcp.f32 %v1627_v39 }
 0x17b   : > { %1175 = vmatpush.bf16.msra.mxu1 %v1546_v58 }
 0x17d   : > { %v1580_v17 = vpop.eup %1579 }
 0x17e   : > { %v927_v18 = vmul.f32 %v1580_v17, %v1576_v6  ;;  %v1582_v40 = vpop.eup %1581  ;;  %v1568_v6 = vld [vmem:[%s1913_s22] ss:$0 sm:$0xff] }
 0x17f   : > { %v1032_v41 = vmul.f32 32.0, %v1582_v40  ;;  %vm1036_vm5 = vweird.f32 %v1582_v40  ;;  %1176 = vmatpush.bf16.msra.mxu1 %v1545_v60 }
 0x180   : > { %v929_v19 = vpack.c.bf16 %v927_v18, %v927_v18 }
 0x181   : > { %v1033_v42 = vsub.f32 1.0, %v1032_v41  ;;  %v1572_v41 = vld [vmem:[%s651_s21] ss:$0 sm:$0xff] }
 0x182   : > { %1463 = vmatmul.msk.bf16.vlgmr.msra.gmra.mxu0 %vm890_vm3, %v929_v19  ;;  %v1570_v19 = vld [vmem:[%s645_s2] ss:$0 sm:$0xff] }
 0x183   : > { %v1034_v43 = vmul.f32 %v1582_v40, %v1033_v42  ;;  %1177 = vmatpush.bf16.msra.mxu1 %v1544_v63 }
 0x185   : > { %v1035_v44 = vadd.f32 %v1582_v40, %v1034_v43 }
 0x187   : > { %v1824_v45 = vsel %vm1036_vm5, %v1582_v40, %v1035_v44  ;;  %1178 = vmatpush.bf16.msra.mxu1 %v1543_v11 }
 0x18b   : > { %1179 = vmatpush.bf16.msra.mxu1 %v1542_v12 }
 0x1f3   : > { %v968_v22 = vpop.f32.mrf.mxu1 }
 0x1f4   : > { %v973_v23 = vpack.c.bf16 %v968_v22, %v968_v22 }
 0x1f6   : > { %1474 = vmatmul.msk.bf16.vlgmr.msra.gmra.mxu3 %vm849_vm2, %v973_v23 }
 0x1fb   : > { %v970_v24 = vpop.f32.mrf.mxu1 }
 0x1ff   : > { %v949_v25 = vpop.f32.mrf.mxu0 }
 0x200   : > { %v972_v26 = vpack.c.bf16 %v949_v25, %v949_v25 }
 0x202   : > { %1469 = vmatmul.msk.bf16.vlgmr.msrb.gmra.mxu2 %vm849_vm2, %v972_v26 }
 0x207   : > { %v951_v27 = vpop.f32.mrf.mxu0 }
 0x279   : > { %v1014_v28 = vpop.f32.mrf.mxu3 }
 0x27a   : > { %v1019_v32 = vsel %vm703_vm1, %v1014_v28, 0.0 }
 0x281   : > { %v1016_v29 = vpop.f32.mrf.mxu3 }
 0x285   : > { %v992_v30 = vpop.f32.mrf.mxu2 }
 0x286   : > { %v1018_v33 = vsel %vm703_vm1, %v992_v30, 0.0 }
 0x287   : > { %v1020_v34 = vadd.f32 %v1019_v32, %v1018_v33 }
 0x289   : > { %v1024_v35 = vadd.f32 %v1566_v31, %v1020_v34 }
 0x28b   : > { %v1025_v36 = vadd.f32 %v1024_v35, %v1783_v5 }
 0x28d   : > { %v994_v37 = vpop.f32.mrf.mxu2  ;;  %v1028_v38 = vsel %vm703_vm1, %v1025_v36, 0.0 }
 0x28e   : > { %1029 = vadd.xlane.f32.xlu0 %v1028_v38  ;;  %v1571_v37 = vld [vmem:[%s648_s24] ss:$0 sm:$0xff] }
 0x301   : > { %v1030_v46 = vpop.xlane.xlu0 %1029 }
 0x302   : > { %v1038_v5 = vmul.f32 %v1824_v45, %v1030_v46 }
 0x304   : > { %v1039_v47 = vsub.f32 %v1025_v36, %v1038_v5 }
 0x306   : > { %v1040_v48 = vmul.f32 %v1039_v47, %v1039_v47  ;;  %v1048_v4 = vmul.f32 %v1567_v1, %v1039_v47 }
 0x308   : > { %v1041_v49 = vsel %vm703_vm1, %v1040_v48, 0.0 }
 0x309   : > { %1042 = vadd.xlane.f32.xlu0 %v1041_v49 }
 0x37c   : > { %v1043_v54 = vpop.xlane.xlu0 %1042 }
 0x37d   : > { %v1044_v55 = vmul.f32 0.032258064, %v1043_v54 }
 0x37f   : > { %v1049_v56 = vadd.f32 1e-12, %v1044_v55 }
 0x381   : > { %1583 = vrsqrt.f32 %v1049_v56  ;;  %vm1056_vm7 = vweird.f32 %v1049_v56 }
 0x387   : > { %v1584_v59 = vpop.eup %1583 }
 0x388   : > { %v1051_v61 = vmul.f32 %v1584_v59, %v1049_v56  ;;  %vm1057_vm6 = vweird.f32 %v1584_v59 }
 0x389   : > { %vm1058_vm8 = vmor %vm1056_vm7, %vm1057_vm6 }
 0x38a   : > { %v1052_v62 = vmul.f32 %v1584_v59, %v1051_v61 }
 0x38c   : > { %v1053_v0 = vmul.f32 0.5, %v1052_v62 }
 0x38e   : > { %v1054_v2 = vsub.f32 1.5, %v1053_v0 }
 0x390   : > { %v1055_v3 = vmul.f32 %v1584_v59, %v1054_v2 }
 0x392   : > { %v1059_v7 = vsel %vm1058_vm8, %v1584_v59, %v1055_v3 }
 0x393   : > { %v1060_v8 = vmul.f32 %v1059_v7, %v1048_v4 }
 0x395   : > { %v1064_v9 = vadd.f32 %v1568_v6, %v1060_v8 }
 0x397   : > { %v1087_v10 = vpack.c.bf16 %v1064_v9, %v1064_v9 }
 0x399   : > { %1483 = vmatmul.msk.bf16.vlgmr.msrb.gmra.mxu0 %vm703_vm1, %v1087_v10 }
 0x416   : > { %v1115_v14 = vpop.f32.mrf.mxu0 }
 0x417   : > { %v1116_v15 = vadd.f32 %v1569_v13, %v1115_v14 }
 0x419   : > { %v1119_v16 = vmax.f32 %v1116_v15, 0.0 }
 0x41b   : > { %v1120_v17 = vpack.c.bf16 %v1119_v16, %v1119_v16 }
 0x41d   : > { %1180 = vmatmul.bf16.vlgmr.msra.gmra.mxu1 %v1120_v17 }
 0x41e   : > { %v1117_v18 = vpop.f32.mrf.mxu0 }
 0x49a   : > { %v1181_v20 = vpop.f32.mrf.mxu1 }
 0x49b   : > { %v1182_v21 = vadd.f32 %v1570_v19, %v1181_v20 }
 0x49d   : > { %v1185_v22 = vadd.f32 %v1182_v21, %v1064_v9 }
 0x49f   : > { %v1188_v23 = vsel %vm703_vm1, %v1185_v22, 0.0 }
 0x4a0   : > { %1189 = vadd.xlane.f32.xlu1 %v1188_v23 }
 0x4a2   : > { %v1183_v24 = vpop.f32.mrf.mxu1 }
 0x513   : > { %v1190_v25 = vpop.xlane.xlu1 %1189 }
 0x514   : > { %v1191_v26 = vmul.f32 %v1190_v25, %v1824_v45 }
 0x516   : > { %v1192_v27 = vsub.f32 %v1185_v22, %v1191_v26 }
 0x518   : > { %v1193_v28 = vmul.f32 %v1192_v27, %v1192_v27  ;;  %v1201_v40 = vmul.f32 %v1571_v37, %v1192_v27 }
 0x51a   : > { %v1194_v29 = vsel %vm703_vm1, %v1193_v28, 0.0 }
 0x51b   : > { %1195 = vadd.xlane.f32.xlu1 %v1194_v29 }
 0x58e   : > { %v1196_v30 = vpop.xlane.xlu1 %1195 }
 0x58f   : > { %v1197_v31 = vmul.f32 0.032258064, %v1196_v30 }
 0x591   : > { %v1202_v32 = vadd.f32 1e-12, %v1197_v31 }
 0x593   : > { %1585 = vrsqrt.f32 %v1202_v32  ;;  %vm1209_vm10 = vweird.f32 %v1202_v32 }
 0x599   : > { %v1586_v33 = vpop.eup %1585 }
 0x59a   : > { %v1204_v34 = vmul.f32 %v1586_v33, %v1202_v32  ;;  %vm1210_vm9 = vweird.f32 %v1586_v33 }
 0x59b   : > { %vm1211_vm11 = vmor %vm1209_vm10, %vm1210_vm9 }
 0x59c   : > { %v1205_v35 = vmul.f32 %v1586_v33, %v1204_v34 }
 0x59e   : > { %v1206_v36 = vmul.f32 0.5, %v1205_v35 }
 0x5a0   : > { %v1207_v38 = vsub.f32 1.5, %v1206_v36 }
 0x5a2   : > { %v1208_v39 = vmul.f32 %v1586_v33, %v1207_v38 }
 0x5a4   : > { %v1212_v42 = vsel %vm1211_vm11, %v1586_v33, %v1208_v39 }
 0x5a5   : > { %v1213_v43 = vmul.f32 %v1212_v42, %v1201_v40 }
 0x5a7   : > { %v1217_v44 = vadd.f32 %v1572_v41, %v1213_v43 }
 0x5a9   : > { %1218 = vst.msk [vmem:[#allocation2] sm:$0xff] %vm703_vm1, %v1217_v44 }
 0x5aa   : > { %1551 = dma.vmem_to_hbm [thread:$0]  (%p1554_p5), %s1226_s20, 128, %s1228_s25, [#allocation3]  }
 0x5ab   : > { %1620 = dma.done.wait (%p1554_p5), [#allocation3], 128  }
 0x5ac   : > { %1622 = vsyncadd (%p1554_p5), [#allocation3], 4294967168 }
 0x5ad PF: > { %s1915_s15 = sld [smem:[#allocation5_spill]] }
 0x5b3   : > { %s25_s29 = sadd.s32 1, %s1915_s15  }
 0x5b4   : > { %p22_p6 = scmp.ge.s32.totalorder %s25_s29, 4  }
 0x5b6   :  { %24 = sbr.rel (!%p22_p6) target bundleno = 8 (0x8), region = 143 }
 0x5bb   :  { %1241 = vsyncpa [#allocation3], 1 }
 0x5bc   :  { %1243 = vsyncpa [#allocation3 + $0x1], 1 }

</bundles_post_ra>
